<compile_context>
chip_gen: v7x
topology: tpu7x:2x2x1
jax: 0.10.0
libtpu: 0.0.40
codegen_flags: <defaults>
</compile_context>

<pallas_src>
import functools

import jax
import jax.numpy as jnp
from jax.experimental import pallas as pl
from jax.experimental.pallas import tpu as pltpu


def _conv1x1_relu_kernel(x_ref, w_ref, o_ref):
    # x_ref: (1, Cin, tn) pixel tile (pixels in lanes); w_ref: (Cout, Cin).
    # (Cout, Cin) @ (Cin, tn) -> (Cout, tn), fused ReLU, lane-dense store.
    y = jnp.dot(w_ref[...], x_ref[0], preferred_element_type=jnp.float32)
    o_ref[0] = jnp.maximum(y, 0.0).astype(o_ref.dtype)


def _vmem_budget_bytes():
    """Per-generation VMEM budget used for tile sizing and vmem_limit_bytes."""
    # v5e / v6e have 128 MiB physical VMEM per TensorCore, v7x only 64 MiB.
    try:
        cap = int(getattr(pltpu.get_tpu_info(), "vmem_capacity_bytes", 64 << 20))
    except Exception:  # conservative fallback if the query is unavailable
        cap = 64 << 20
    return max(16 << 20, min(48 << 20, cap // 2))


def _pick_tile(M, B, bytes_per_lane, vmem_budget, *, max_tile=64 * 1024):
    """Largest lane tile (multiple of 128, or the full dim) within the budget.

    Targets ~1.5-3 MB of HBM traffic per grid step (amortizes the ~0.35 us
    per-step pipeline overhead) while keeping roughly >= 8 total grid steps
    (B * nt) so double-buffering overlaps DMA and v7x's two TensorCores both
    get work.
    """
    cap = min(max_tile, vmem_budget // (2 * bytes_per_lane))  # double-buffered
    cap = max(128, cap // 128 * 128)
    min_steps = -(-8 // max(B, 1))                 # ceil(8 / B)
    even = max(512, -(-M // min_steps))            # even-ish split over steps
    even = -(-even // 128) * 128
    tn = min(cap, even)
    if M <= tn:
        return M, 1                                # full-dim block, no masking
    return tn, -(-M // tn)                         # masked last tile, no pad


def conv1x1_relu_T(x, w):
    """x: (B, Cin, M), w: (Cout, Cin)  ->  relu(w @ x[b]) : (B, Cout, M)."""
    B, Cin, M = x.shape
    Cout, Cin2 = w.shape
    assert Cin == Cin2
    itemsize = jnp.dtype(x.dtype).itemsize

    budget = _vmem_budget_bytes()
    # Reserve room for the (double-buffered) weight block + Mosaic scratch so
    # the tile accounting is consistent with vmem_limit_bytes.
    reserve = 2 * Cout * Cin * itemsize + (4 << 20)
    tn, nt = _pick_tile(M, B, (Cin + Cout) * itemsize, budget - reserve)

    cost = pl.CostEstimate(
        flops=2 * B * Cout * Cin * M,
        transcendentals=0,
        bytes_accessed=itemsize * (B * M * (Cin + Cout) + Cout * Cin),
    )
    return pl.pallas_call(
        _conv1x1_relu_kernel,
        out_shape=jax.ShapeDtypeStruct((B, Cout, M), x.dtype),
        grid_spec=pltpu.PrefetchScalarGridSpec(
            num_scalar_prefetch=0,
            grid=(B, nt),
            in_specs=[
                pl.BlockSpec((1, Cin, tn), lambda b, t: (b, 0, t)),   # pixel tile
                pl.BlockSpec((Cout, Cin), lambda b, t: (0, 0)),       # full weight
            ],
            out_specs=pl.BlockSpec((1, Cout, tn), lambda b, t: (b, 0, t)),
        ),
        compiler_params=pltpu.CompilerParams(
            dimension_semantics=("parallel", "parallel"),  # megacore-shardable
            vmem_limit_bytes=budget,                       # <= 32 MiB on v7x
        ),
        cost_estimate=cost,
    )(x, w)


def drm_forward(x, w_conv, scale):
    """DRM forward.  x: (B, Cin, H, W) NCHW; w_conv: (Cout, Cin, 1, 1)."""
    B, Cin, H, W = x.shape
    Cout = w_conv.shape[0]
    s = int(scale)
    h_num, w_num = H // s, W // s
    M = s * s * h_num * w_num
    w = w_conv.reshape(Cout, Cin).astype(x.dtype)

    # The 1x1 conv commutes with the spatial rearrangement, so the single XLA
    # relayout pass goes on whichever side carries fewer channels.
    if Cin <= Cout:
        # Space-to-depth on the INPUT; kernel writes the final layout directly.
        xc = x[:, :, : h_num * s, : w_num * s]
        xc = xc.reshape(B, Cin, h_num, s, w_num, s)
        xc = jnp.transpose(xc, (0, 1, 3, 5, 2, 4)).reshape(B, Cin, M)
        y = conv1x1_relu_T(xc, w)                       # (B, Cout, M), M=(i,j,bh,bw)
        # (Cout, s*s) and (h_num, w_num) are adjacent axes => free reshape.
        return y.reshape(B, Cout * s * s, h_num, w_num)
    else:
        # Conv in the original pixel order; space-to-depth on the (smaller) output.
        xc = x[:, :, : h_num * s, : w_num * s].reshape(B, Cin, M)
        y = conv1x1_relu_T(xc, w)                       # (B, Cout, M), M=(bh,i,bw,j)
        y = y.reshape(B, Cout, h_num, s, w_num, s)
        y = jnp.transpose(y, (0, 1, 3, 5, 2, 4))
        return y.reshape(B, Cout * s * s, h_num, w_num)


def _drm_reference(x, w_conv, scale):
    """Pure-JAX mirror of the PyTorch DRM.forward semantics."""
    Cout, Cin = w_conv.shape[0], w_conv.shape[1]
    y = jnp.maximum(jnp.einsum("bihw,oi->bohw", x, w_conv.reshape(Cout, Cin)), 0.0)
    B, _, H, W = y.shape
    s = int(scale)
    h_num, w_num = H // s, W // s
    y = y[:, :, : h_num * s, : w_num * s]
    y = y.reshape(B, Cout, h_num, s, w_num, s)
    return jnp.transpose(y, (0, 1, 3, 5, 2, 4)).reshape(
        B, Cout * s * s, h_num, w_num)


if __name__ == "__main__":
    key = jax.random.PRNGKey(0)
    configs = [
        # (B, Cin, H, W, Cout, scale)
        (2, 4, 16, 16, 8, 2),    # Cin < Cout: rearrangement on the input side
        (2, 8, 16, 16, 4, 4),    # Cin > Cout: rearrangement on the output side
        (2, 4, 10, 10, 6, 3),    # H, W not divisible by scale: exercises crop
    ]
    for (B, Cin, H, W, Cout, scale) in configs:
        key, kx, kw = jax.random.split(key, 3)
        x = jax.random.normal(kx, (B, Cin, H, W), dtype=jnp.float32)
        # Conv2d(in_dim, inner_channel, 1, bias=False) weight.
        w_conv = 0.1 * jax.random.normal(kw, (Cout, Cin, 1, 1), dtype=jnp.float32)

        drm = jax.jit(functools.partial(drm_forward, scale=scale))
        out = jax.block_until_ready(drm(x, w_conv))

        ref = _drm_reference(x, w_conv, scale)
        h_num, w_num = H // scale, W // scale
        assert out.shape == (B, Cout * scale * scale, h_num, w_num), out.shape
        # MXU default f32 matmul precision differs marginally from the XLA
        # einsum reference; tolerance has margin for that but still catches
        # any real layout / permutation bug.
        err = float(jnp.max(jnp.abs(out - ref)))
        assert jnp.allclose(out, ref, atol=5e-5, rtol=5e-5), err
    print("KERNEL_OK")
</pallas_src>

<mosaic_0001>
module attributes {stable_mosaic.version = 11 : i64} {
  func.func @_conv1x1_relu_kernel(%arg0: i32, %arg1: i32, %arg2: memref<1x4x256xf32, #tpu.memory_space<vmem>>, %arg3: memref<8x4xf32, #tpu.memory_space<vmem>>, %arg4: memref<1x8x256xf32, #tpu.memory_space<vmem>>) attributes {dimension_semantics = [#tpu.dimension_semantics<parallel>, #tpu.dimension_semantics<parallel>], iteration_bounds = array<i64: 2, 1>, scalar_prefetch = 0 : i64, scratch_operands = 0 : i64, tpu.core_type = #tpu.core_type<tc>, window_params = [{transform_indices = @transform_0, window_bounds = array<i64: 1, 4, 256>}, {pipeline_mode = #tpu.pipeline_mode<synchronous>, transform_indices = @transform_1, window_bounds = array<i64: 8, 4>}, {transform_indices = @transform_2, window_bounds = array<i64: 1, 8, 256>}]} {
    %c0 = arith.constant 0 : index
    %c0_0 = arith.constant 0 : index
    %0 = vector.load %arg3[%c0, %c0_0] : memref<8x4xf32, #tpu.memory_space<vmem>>, vector<8x4xf32>
    %c0_1 = arith.constant 0 : index
    %c0_2 = arith.constant 0 : index
    %c0_3 = arith.constant 0 : index
    %1 = vector.load %arg2[%c0_1, %c0_2, %c0_3] : memref<1x4x256xf32, #tpu.memory_space<vmem>>, vector<1x4x256xf32>
    %2 = vector.shape_cast %1 : vector<1x4x256xf32> to vector<4x256xf32>
    %cst = arith.constant dense<0.000000e+00> : vector<8x256xf32>
    %3 = tpu.matmul %0, %2, %cst {dimension_numbers = #tpu.dot_dimension_numbers<[1], [0], [0], [1], [0, 0, 1, 1], [], []>} : vector<8x4xf32>, vector<4x256xf32>, vector<8x256xf32> -> vector<8x256xf32>
    %cst_4 = arith.constant 0.000000e+00 : f32
    %4 = vector.broadcast %cst_4 : f32 to vector<8x256xf32>
    %5 = arith.maximumf %3, %4 : vector<8x256xf32>
    %c0_5 = arith.constant 0 : index
    %c0_6 = arith.constant 0 : index
    %c0_7 = arith.constant 0 : index
    %6 = vector.load %arg4[%c0_5, %c0_6, %c0_7] : memref<1x8x256xf32, #tpu.memory_space<vmem>>, vector<1x8x256xf32>
    %7 = vector.shape_cast %6 : vector<1x8x256xf32> to vector<8x256xf32>
    %8 = vector.shape_cast %5 : vector<8x256xf32> to vector<1x8x256xf32>
    tpu.vector_store %arg4[%c0_5, %c0_6, %c0_7], %8 {strides = array<i32>} : memref<1x8x256xf32, #tpu.memory_space<vmem>>, vector<1x8x256xf32>,
    return
  }
  func.func @transform_0(%arg0: i32, %arg1: i32) -> (i32, i32, i32) {
    %c0_i32 = arith.constant 0 : i32
    %c0_i32_0 = arith.constant 0 : i32
    return %arg0, %c0_i32, %arg1 : i32, i32, i32
  }
  func.func @transform_1(%arg0: i32, %arg1: i32) -> (i32, i32) {
    %c0_i32 = arith.constant 0 : i32
    %c0_i32_0 = arith.constant 0 : i32
    %c0_i32_1 = arith.constant 0 : i32
    return %c0_i32, %c0_i32_0 : i32, i32
  }
  func.func @transform_2(%arg0: i32, %arg1: i32) -> (i32, i32, i32) {
    %c0_i32 = arith.constant 0 : i32
    %c0_i32_0 = arith.constant 0 : i32
    return %arg0, %c0_i32, %arg1 : i32, i32, i32
  }
}

</mosaic_0001>

<bundles_post_ra>
// kernel: drm_forward.1
= control target key start
LH: loop header
LB: loop body
LE: loop exit
PB: predicated region body
PF: predicated region fallthrough
CT: control target
= control target key end

     0   :  { %s440_s9 = smov 0   ;;  %s442_s10 = smov 0   ;;  %s473_s0 = inlined_call_operand.vmem [shape: f32[2,4,256], index: 0, kind: input, shape index: {}]   ;;  %s474_s1 = inlined_call_operand.vmem [shape: f32[8,4], index: 1, kind: input, shape index: {}]   ;;  %s475_s2 = inlined_call_operand.vmem [shape: f32[2,8,256], index: 2, kind: output, shape index: {}]  }
   0x1   :  { %s444_s11 = smov 0  }
   0x2 LB: > { %s24_s12 = sadd.s32 1, %s418_s10  ;;  %p362_p0 = scmp.ge.s32.totalorder %s422_s11, 1  ;;  %s422_s11 = sphi %s444_s11, %s12_s11   ;;  %s418_s10 = sphi %s442_s10, %s477_s10   ;;  %s414_s9 = sphi %s440_s9, %s476_s9  }
   0x3   : > { %p26_p1 = scmp.ge.s32.totalorder %s24_s12, 2  ;;  %p133_p2 = scmp.lt.s32.totalorder %s422_s11, 3 }
   0x5   : > { %s479_s12 = smov (%p26_p1, %s24_s12), 0  ;;  %p134_p3 = pnand %p362_p0, %p133_p2 }
   0x6   : > { %p164_p4 = scmp.lt.s32.totalorder (!%p134_p3), %s414_s9, 1  ;;  %v424_v0 = vmov (!%p134_p3), 0.0   ;;  %vm191_vm0 = vcmask (!%p134_p3), 1043456   ;;  %v183_v3 = vld [vmem:[%s474_s1] sm:$0xff] (!%p134_p3)  ;;  %vm187_vm1 = vcmask (!%p134_p3), 31744  }
   0x7   : > { %137 = sbr.rel (%p134_p3) target bundleno = 238 (0xee), region = 28  ;;  %260 = vmatprep.mubr.f32.mxu0 (!%p134_p3), %v424_v0 }
   0xe   : > { %s481_s9 = smov (!%p164_p4, %s414_s9), 1 }
   0xf   : > { %s372_s13 = sshll.u32 %s481_s9, 3  ;;  %s373_s19 = sshll.u32 %s481_s9, 4 }
  0x10   : > { %s171_s16 = scalar_lea.vmem %s473_s0, %s372_s13  ;;  %s181_s22 = scalar_lea.vmem %s475_s2, %s373_s19 }
  0x11   : > { %v184_v1 = vld [vmem:[%s171_s16] sm:$0xff] }
  0x12   : > { %v186_v2 = vcombine.high %v184_v1, %v184_v1 }
  0x14   : > { %367 = vmatprep.subr.msk.mxu0 %vm191_vm0, %v186_v2 }
  0x15   : > { %368 = vmatpush1.msk.msra.mxu0 %vm191_vm0, %v184_v1 }
  0x16   : > { %369 = vmatmul.mubr.msk.f32.vlgmr.msra.gmra.mrb[0].mxu0 %vm187_vm1, %v183_v3 }
  0xe9   : > { %v262_v4 = vpop.f32.mrb[0].mxu0 }
  0xea   : > { %v267_v5 = vmax.f32 %v262_v4, 0.0  ;;  %v264_v6 = vpop.f32.mrb[1].mxu0 }
  0xeb   : > { %v268_v7 = vmax.f32 %v264_v6, 0.0 }
  0xec   : > { %269 = vst [vmem:[%s181_s22] sm:$0xff] %v267_v5 }
  0xed   : > { %270 = vst [vmem:[%s181_s22 + $0x8] sm:$0xff] %v268_v7 }
  0xee PF: > { %s12_s11 = sadd.s32 1, %s422_s11   ;;  %s476_s9 = smov %s418_s10 }
  0xef   : > { %p9_p5 = scmp.ge.s32.totalorder %s12_s11, 4   ;;  %s477_s10 = smov %s479_s12 }
  0xf1   :  { %11 = sbr.rel (!%p9_p5) target bundleno = 2 (0x2), region = 58 }

</bundles_post_ra>
